<compile_context>
chip_gen: v6e
topology: v6e:2x2x1
jax: 0.10.0
libtpu: 0.0.40
codegen_flags: <defaults>
</compile_context>

<pallas_src>
import functools
import math

import jax
import jax.numpy as jnp
import numpy as np
from jax.experimental import pallas as pl
from jax.experimental.pallas import tpu as pltpu


def _spreader_kernel(x_ref, o_ref, *, w_ceil: int, logical_w: int):
    x = x_ref[...].astype(jnp.float32)               # accumulate in f32 (conv2d-like)
    wp = x.shape[-1]

    # (1, wp) lane-position row; broadcasts inside the where -> no tile-sized
    # int32 iota result or f32 zeros temporaries.
    lane_pos = jax.lax.broadcasted_iota(jnp.int32, (1, wp), 1) % logical_w

    def masked_shift(z, s):
        # z shifted right by s lanes; zeroed where the shift would cross a logical row
        # boundary (this also kills the circular-roll wrap and packed-row leakage).
        return jnp.where(lane_pos >= s, pltpu.roll(z, shift=s, axis=1), 0.0)

    # Causal trailing box sum of length L via log-depth doubling:
    #   pw  = windowed sum of length p (power of two)
    #   acc = windowed sum of length `built` (the low bits of L consumed so far)
    # O(log2 L) roll+mask+add steps instead of O(L) -> stays memory-bound on v7x/bf16.
    # TODO(synk): for packed bf16/int inputs an alternative is a single MXU matmul
    # against a constant (wp, wp) banded 0/1 matrix, making cost independent of L.
    L = min(w_ceil, logical_w)
    acc = None
    built = 0
    pw = x
    p = 1
    rem = L
    while True:
        if rem & 1:
            acc = pw if acc is None else acc + masked_shift(pw, built)
            built += p
        rem >>= 1
        if rem == 0:
            break
        pw = pw + masked_shift(pw, p)
        p *= 2

    o_ref[...] = acc.astype(o_ref.dtype)


def lenticule_spreader(x: jax.Array, w_ceil: int) -> jax.Array:
    """x: (N, C, H, W) with C in {1, 3}, NCHW like the PyTorch module."""
    if x.shape[1] not in (1, 3):
        raise NotImplementedError("LenticuleSpreader supports C == 1 or C == 3")
    n, c, h, w = x.shape
    rows = n * c * h
    itemsize = jnp.dtype(x.dtype).itemsize

    # ---- lane packing: pack k logical rows per physical row so wp = k*w is a
    # multiple of 128 (lane-dense blocks, unmasked stores), for any W.
    k = 128 // math.gcd(w, 128)           # smallest k with (k * w) % 128 == 0
    if k * w > 32768:                     # very wide odd rows: lane waste already tiny
        k = 1
    wp = k * w

    # Pad rows to a multiple of k (<= k-1 zero rows) instead of collapsing to a
    # lane-sparse k=1 layout when N*C*H has an awkward factorization.
    rows_pad = ((rows + k - 1) // k) * k
    x2d = x.reshape(rows, w)
    if rows_pad != rows:
        x2d = jnp.pad(x2d, ((0, rows_pad - rows), (0, 0)))
    rows_p = rows_pad // k
    x2d = x2d.reshape(rows_p, wp)

    # ---- row-tile size: ~1 MiB input block (safe vs v5e's 16 MiB scoped VMEM once the
    # f32 temporaries are counted), multiple of 8 sublanes, and capped so the grid has
    # >= 8 steps when possible (>= 4 pipelined steps per TensorCore on v7x megacore).
    tm = (1 << 20) // max(1, wp * itemsize)
    tm = max(8, min(1024, (tm // 8) * 8))
    depth_cap = ((pl.cdiv(rows_p, 8) + 7) // 8) * 8
    tm = max(8, min(tm, depth_cap))
    if rows_p < 8:
        tm = rows_p                        # full-extent sublane block (allowed)
    grid = pl.cdiv(rows_p, tm)             # partial last tile is masked by Pallas

    kernel = functools.partial(_spreader_kernel, w_ceil=w_ceil, logical_w=w)
    out2d = pl.pallas_call(
        kernel,
        out_shape=jax.ShapeDtypeStruct((rows_p, wp), x.dtype),
        grid_spec=pltpu.PrefetchScalarGridSpec(
            num_scalar_prefetch=0,
            grid=(grid,),
            in_specs=[pl.BlockSpec((tm, wp), lambda i: (i, 0))],
            out_specs=pl.BlockSpec((tm, wp), lambda i: (i, 0)),
        ),
        compiler_params=pltpu.CompilerParams(
            dimension_semantics=("parallel",),
            # >= v5e's 16 MiB default, == v6e/v7x default, well under v7x's 64 MiB VMEM.
            vmem_limit_bytes=32 * 1024 * 1024,
        ),
        cost_estimate=pl.CostEstimate(
            flops=2 * rows * w * min(w_ceil, w),
            transcendentals=0,
            bytes_accessed=2 * rows_p * wp * itemsize,
        ),
    )(x2d)

    out = out2d.reshape(rows_pad, w)
    if rows_pad != rows:
        out = out[:rows]
    return out.reshape(n, c, h, w)


def _reference(x: np.ndarray, w_ceil: int) -> np.ndarray:
    # Direct trailing box sum (equivalent to the torch.conv2d formulation), f64 accum.
    x = np.asarray(x, np.float64)
    W = x.shape[-1]
    y = np.zeros_like(x)
    for d in range(min(w_ceil, W)):
        if d == 0:
            y += x
        else:
            y[..., d:] += x[..., : W - d]
    return y


if __name__ == "__main__":
    key = jax.random.PRNGKey(0)
    keys = jax.random.split(key, 5)

    cases = [
        ((2, 3, 16, 16), 5, jnp.float32, 1e-5),    # W<128, packing k=8 -> wp=128
        ((2, 1, 16, 16), 5, jnp.float32, 1e-5),    # 1-channel path
        ((1, 3, 8, 160), 9, jnp.float32, 1e-5),    # W>=128 packing: k=4 -> wp=640
        ((1, 3, 5, 16), 7, jnp.float32, 1e-5),     # rows=15 not divisible by k=8 -> row pad
        ((2, 3, 16, 16), 4, jnp.bfloat16, 2e-2),   # bf16 input, f32 accumulation
    ]
    for (shape, w_ceil, dtype, tol), kk in zip(cases, keys):
        x = jax.random.normal(kk, shape, dtype=dtype)
        y = jax.block_until_ready(lenticule_spreader(x, w_ceil))
        ref = _reference(np.asarray(x).astype(np.float64), w_ceil)
        np.testing.assert_allclose(
            np.asarray(y).astype(np.float64), ref, rtol=tol, atol=tol)

    print("KERNEL_OK")
</pallas_src>

<mosaic_0001>
module attributes {stable_mosaic.version = 11 : i64} {
  func.func @_spreader_kernel(%arg0: i32, %arg1: memref<8x128xf32, #tpu.memory_space<vmem>>, %arg2: memref<8x128xf32, #tpu.memory_space<vmem>>) attributes {dimension_semantics = [#tpu.dimension_semantics<parallel>], iteration_bounds = array<i64: 2>, scalar_prefetch = 0 : i64, scratch_operands = 0 : i64, tpu.core_type = #tpu.core_type<tc>, window_params = [{transform_indices = @transform_0, window_bounds = array<i64: 8, 128>}, {transform_indices = @transform_1, window_bounds = array<i64: 8, 128>}]} {
    %c0 = arith.constant 0 : index
    %c0_0 = arith.constant 0 : index
    %0 = vector.load %arg1[%c0, %c0_0] : memref<8x128xf32, #tpu.memory_space<vmem>>, vector<8x128xf32>
    %1 = tpu.iota {dimensions = array<i32: 1>} : vector<1x128xi32>
    %c16_i32 = arith.constant 16 : i32
    %c0_i32 = arith.constant 0 : i32
    %2 = arith.cmpi eq, %c16_i32, %c0_i32 : i32
    %c1_i32 = arith.constant 1 : i32
    %3 = arith.select %2, %c1_i32, %c16_i32 : i32
    %4 = vector.broadcast %3 : i32 to vector<1x128xi32>
    %5 = arith.remsi %1, %4 : vector<1x128xi32>
    %c0_i32_1 = arith.constant 0 : i32
    %6 = vector.broadcast %c0_i32_1 : i32 to vector<1x128xi32>
    %7 = arith.cmpi ne, %5, %6 : vector<1x128xi32>
    %c0_i32_2 = arith.constant 0 : i32
    %8 = vector.broadcast %c0_i32_2 : i32 to vector<1x128xi32>
    %9 = arith.cmpi slt, %5, %8 : vector<1x128xi32>
    %c0_i32_3 = arith.constant 0 : i32
    %10 = arith.cmpi slt, %3, %c0_i32_3 : i32
    %11 = vector.broadcast %10 : i1 to vector<1x128xi1>
    %12 = vector.broadcast %11 : vector<1x128xi1> to vector<1x128xi1>
    %13 = arith.xori %9, %12 : vector<1x128xi1>
    %14 = arith.andi %13, %7 : vector<1x128xi1>
    %15 = vector.broadcast %3 : i32 to vector<1x128xi32>
    %16 = arith.addi %5, %15 : vector<1x128xi32>
    %17 = arith.select %14, %16, %5 : vector<1x128xi1>, vector<1x128xi32>
    %c1_i32_4 = arith.constant 1 : i32
    %18 = vector.broadcast %c1_i32_4 : i32 to vector<1x128xi32>
    %19 = arith.cmpi sge, %17, %18 : vector<1x128xi32>
    %c1_i32_5 = arith.constant 1 : i32
    %20 = tpu.dynamic_rotate %0 by %c1_i32_5 dim 1 : vector<8x128xf32>, i32 -> vector<8x128xf32>
    %cst = arith.constant 0.000000e+00 : f32
    %21 = vector.shape_cast %19 : vector<1x128xi1> to vector<1x128xi1>
    %22 = vector.broadcast %21 : vector<1x128xi1> to vector<8x128xi1>
    %23 = vector.broadcast %cst : f32 to vector<8x128xf32>
    %24 = arith.select %22, %20, %23 : vector<8x128xi1>, vector<8x128xf32>
    %25 = arith.addf %0, %24 : vector<8x128xf32>
    %c2_i32 = arith.constant 2 : i32
    %26 = vector.broadcast %c2_i32 : i32 to vector<1x128xi32>
    %27 = arith.cmpi sge, %17, %26 : vector<1x128xi32>
    %c2_i32_6 = arith.constant 2 : i32
    %28 = tpu.dynamic_rotate %25 by %c2_i32_6 dim 1 : vector<8x128xf32>, i32 -> vector<8x128xf32>
    %cst_7 = arith.constant 0.000000e+00 : f32
    %29 = vector.shape_cast %27 : vector<1x128xi1> to vector<1x128xi1>
    %30 = vector.broadcast %29 : vector<1x128xi1> to vector<8x128xi1>
    %31 = vector.broadcast %cst_7 : f32 to vector<8x128xf32>
    %32 = arith.select %30, %28, %31 : vector<8x128xi1>, vector<8x128xf32>
    %33 = arith.addf %25, %32 : vector<8x128xf32>
    %c1_i32_8 = arith.constant 1 : i32
    %34 = vector.broadcast %c1_i32_8 : i32 to vector<1x128xi32>
    %35 = arith.cmpi sge, %17, %34 : vector<1x128xi32>
    %c1_i32_9 = arith.constant 1 : i32
    %36 = tpu.dynamic_rotate %33 by %c1_i32_9 dim 1 : vector<8x128xf32>, i32 -> vector<8x128xf32>
    %cst_10 = arith.constant 0.000000e+00 : f32
    %37 = vector.shape_cast %35 : vector<1x128xi1> to vector<1x128xi1>
    %38 = vector.broadcast %37 : vector<1x128xi1> to vector<8x128xi1>
    %39 = vector.broadcast %cst_10 : f32 to vector<8x128xf32>
    %40 = arith.select %38, %36, %39 : vector<8x128xi1>, vector<8x128xf32>
    %41 = arith.addf %0, %40 : vector<8x128xf32>
    %c0_11 = arith.constant 0 : index
    %c0_12 = arith.constant 0 : index
    %42 = vector.load %arg2[%c0_11, %c0_12] : memref<8x128xf32, #tpu.memory_space<vmem>>, vector<8x128xf32>
    tpu.vector_store %arg2[%c0_11, %c0_12], %41 {strides = array<i32>} : memref<8x128xf32, #tpu.memory_space<vmem>>, vector<8x128xf32>,
    return
  }
  func.func @transform_0(%arg0: i32) -> (i32, i32) {
    %c0_i32 = arith.constant 0 : i32
    %c0_i32_0 = arith.constant 0 : i32
    return %arg0, %c0_i32 : i32, i32
  }
  func.func @transform_1(%arg0: i32) -> (i32, i32) {
    %c0_i32 = arith.constant 0 : i32
    %c0_i32_0 = arith.constant 0 : i32
    return %arg0, %c0_i32 : i32, i32
  }
}

</mosaic_0001>

<bundles_post_ra>
// kernel: tpu_custom_call.1
= control target key start
LH: loop header
LB: loop body
LE: loop exit
PB: predicated region body
PF: predicated region fallthrough
CT: control target
= control target key end

     0   :  { %6 = vsyncpa [#allocation3], 0  ;;  %s567_s0 = inlined_call_operand.hbm [shape: f32[12,128], index: 0, kind: input, shape index: {}]   ;;  %s568_s1 = inlined_call_operand.hbm [shape: f32[12,128], index: 1, kind: output, shape index: {}]  }
   0x1   :  { %8 = vsyncpa [#allocation3 + $0x1], 0 }
   0x2   :  { %9 = vsyncpa [#allocation4], 0 }
   0x3   :  { %11 = vsyncpa [#allocation4 + $0x1], 0  ;;  %s418_s6 = smov 0   ;;  %s420_s7 = smov 0  }
   0x4   :  { %s422_s8 = smov 0   ;;  %s424_s9 = smov 0  }
   0x5 LB: > { %s439_s10 = sadd.s32 4294967295, %s402_s9   ;;  %s250_s11 = sadd.s32 4294967294, %s402_s9   ;;  %s402_s9 = sphi %s424_s9, %s587_s9   ;;  %s398_s8 = sphi %s422_s8, %s586_s8   ;;  %s394_s7 = sphi %s420_s7, %s585_s7   ;;  %s390_s6 = sphi %s418_s6, %s584_s6  }
   0x6   : > { %s443_s12 = sadd.s32 1, %s402_s9   ;;  %s24_s13 = sadd.s32 1, %s398_s8 }
   0x7   : > { %s21_s14 = ssub.s32 %s402_s9, %s443_s12  ;;  %p31_p0 = scmp.ne.s32.totalorder %s398_s8, %s394_s7 }
   0x8   : > { %p22_p1 = scmp.eq.s32.totalorder %s21_s14, 0  ;;  %p32_p2 = scmp.eq.s32.totalorder %s402_s9, 0 }
   0x9   : > { %p37_p3 = scmp.ne.s32.totalorder %s394_s7, %s390_s6  ;;  %p38_p4 = scmp.eq.s32.totalorder %s439_s10, 0 }
   0xa   : > { %s455_s15 = scalar_select %p22_p1, %s398_s8, %s24_s13  }
   0xb   : > { %p457_p5 = por %p32_p2, %p31_p0  ;;  %p461_p6 = por %p38_p4, %p37_p3 }
   0xc   : > { %p61_p7 = scmp.eq.s32.totalorder %s439_s10, 1  ;;  %p67_p8 = scmp.eq.s32.totalorder %s250_s11, 1 }
   0xd   : > { %s572_s17 = scalar_select %p461_p6, 1, 0 }
   0xe   : > { %p274_p10 = scmp.lt.s32.totalorder %s402_s9, 2  ;;  %p468_p11 = por %p61_p7, %p31_p0 }
   0xf   : > { %p472_p12 = por %p67_p8, %p37_p3  ;;  %s87_s20 = sand.u32 1, %s398_s8  }
  0x10   : > { %s573_s18 = scalar_select %p468_p11, 1, 0 }
  0x11   : > { %s574_s19 = scalar_select %p472_p12, 1, 0 }
  0x12   : > { %s254_s21 = sshll.u32 %s402_s9, 7  ;;  %s253_s22 = sshll.u32 %s87_s20, 3 }
  0x13   : > { %s481_s25 = scalar_lea.hbm %s567_s0, %s254_s21  ;;  %s91_s26 = scalar_lea.vmem [#allocation2], %s253_s22 }
  0x14   : > { %s98_s27 = sshll.u32 %s91_s26, 4  ;;  %p485_p13 = pnand %p274_p10, %p457_p5  ;;  %s489_s27 = int_to_ptr.vmem [resolvable:$true] %s98_s27 }
  0x15   : > { %s88_s29 = scalar_lea.sflag [#allocation3], %s87_s20  ;;  %s310_s30 = scalar_lea.hbm %s481_s25, 128 }
  0x16   : > { %p311_p2 = scmp.ne.s32.totalorder %s481_s25, %s310_s30  ;;  %p312_p3 = pneg %p485_p13 }
  0x17   : > { %s315_s4 = scalar_lea.hbm %s567_s0, 256  ;;  %p316_p5 = scmp.lt.s32.totalorder %s481_s25, %s567_s0 }
  0x18   : > { %p313_p4 = pnand %p312_p3, %p311_p2  ;;  %p317_p8 = scmp.lt.s32.totalorder %s315_s4, %s310_s30 }
  0x1a   : > { %p314_p7 = pneg %p313_p4  ;;  %p318_p10 = por %p317_p8, %p316_p5 }
  0x1c   : > { %p319_p9 = pnand %p318_p10, %p314_p7 }
  0x1e   : > { %322 = shalt.err (!%p319_p9)
}
  0x1f   : > { %s323_s13 = scalar_lea.vmem %s489_s27, 128  ;;  %s404_s14 = smov [#allocation2]  }
  0x20   : > { %p324_p0 = scmp.ne.s32.totalorder %s489_s27, %s323_s13  ;;  %s328_s16 = sshll.u32 %s404_s14, 4  ;;  %s329_s16 = int_to_ptr.vmem [resolvable:$false] %s328_s16 }
  0x21   : > { %s330_s20 = scalar_lea.vmem %s329_s16, 256  ;;  %p331_p4 = scmp.lt.s32.totalorder %s489_s27, %s329_s16 }
  0x22   : > { %p326_p1 = pnand %p324_p0, %p312_p3  ;;  %p332_p12 = scmp.lt.s32.totalorder %s330_s20, %s323_s13 }
  0x24   : > { %p327_p2 = pneg %p326_p1  ;;  %p333_p11 = por %p332_p12, %p331_p4 }
  0x26   : > { %p334_p6 = pnand %p333_p11, %p327_p2 }
  0x28   : > { %337 = shalt.err (!%p334_p6)
}
  0x29   : > { %269 = dma.hbm_to_vmem [thread:$0]  (!%p485_p13), %s481_s25, 128, %s489_s27, %s88_s29  }
  0x2a   : > { %p576_p9 = scmp.lt.s32.totalorder %s402_s9, 3  ;;  %p577_p7 = scmp.ge.s32.totalorder %s402_s9, 1 }
  0x2c   : > { %p104_p0 = pnand %p577_p7, %p576_p9 }
  0x2d   : > { %s516_s21 = sand.u32 (!%p104_p0), 1, %s394_s7   ;;  %p578_p6 = scmp.ne.s32.totalorder (!%p104_p0), %s572_s17, 0 }
  0x2e   : > { %107 = sbr.rel (%p104_p0) target bundleno = 420 (0x1a4), region = 24  ;;  %s256_s22 = sshll.u32 (!%p104_p0), %s516_s21, 3 }
  0x2f   : > { %s110_s23 = scalar_lea.sflag (!%p104_p0), [#allocation3], %s516_s21  ;;  %s113_s24 = scalar_lea.vmem (!%p104_p0), [#allocation2], %s256_s22 }
  0x33   : > { %381 = dma.done.wait (%p578_p6), %s110_s23, 128  }
  0x34   : > { %383 = vsyncadd (%p578_p6), %s110_s23, 4294967168  ;;  %v132_v0 = vld [vmem:[%s113_s24] sm:$0xff]  ;;  %s405_s25 = smov 1   ;;  %v133_v1 = vlaneseq  ;;  %s406_s26 = smov 2  }
  0x35   : > { %148 = vrot.lane.b32.xlu0 %v132_v0, %s405_s25  ;;  %s259_s17 = sshll.u32 %s439_s10, 7  ;;  %s131_s27 = scalar_lea.vmem [#allocation5], %s256_s22 }
  0x36   : > { %v134_v2 = vand.u32 127, %v133_v1  ;;  %s180_s28 = sshll.u32 %s131_s27, 4  ;;  %s178_s2 = scalar_lea.hbm %s568_s1, %s259_s17  ;;  %s181_s28 = int_to_ptr.vmem [resolvable:$true] %s180_s28 }
  0x37   : > { %s167_s3 = scalar_lea.sflag [#allocation4], %s516_s21  ;;  %s338_s4 = scalar_lea.vmem %s181_s28, 128 }
  0x38   : > { %v139_v3 = vand.u32 15, %v134_v2  ;;  %p339_p11 = scmp.ne.s32.totalorder %s181_s28, %s338_s4  ;;  %p581_p12 = scmp.ne.s32.totalorder %s573_s18, 0 }
  0x39   : > { %s407_s10 = smov [#allocation5]  }
  0x3a   : > { %vm524_vm0 = vcmp.ge.s32.totalorder %v139_v3, 1  ;;  %vm154_vm1 = vcmp.ge.s32.totalorder %v139_v3, 2  ;;  %p340_p13 = pnand %p339_p11, %p581_p12  ;;  %s342_s5 = sshll.u32 %s407_s10, 4  ;;  %s343_s5 = int_to_ptr.vmem [resolvable:$false] %s342_s5 }
  0x3b   : > { %s344_s11 = scalar_lea.vmem %s343_s5, 256  ;;  %p345_p3 = scmp.lt.s32.totalorder %s181_s28, %s343_s5 }
  0x3c   : > { %p341_p1 = pneg %p340_p13  ;;  %p346_p5 = scmp.lt.s32.totalorder %s344_s11, %s338_s4 }
  0x3e   : > { %p347_p8 = por %p346_p5, %p345_p3 }
  0x40   : > { %p348_p10 = pnand %p347_p8, %p341_p1 }
  0xa7   : > { %v149_v5 = vpop.permute.xlu0 %148 }
  0xa8   : > { %v152_v6 = vsel %vm524_vm0, %v149_v5, 0.0 }
  0xa9   : > { %v153_v7 = vadd.f32 %v152_v6, %v132_v0 }
  0xab   : > { %155 = vrot.lane.b32.xlu0 %v153_v7, %s406_s26 }
 0x11d   : > { %v156_v8 = vpop.permute.xlu0 %155 }
 0x11e   : > { %v159_v9 = vsel %vm154_vm1, %v156_v8, 0.0 }
 0x11f   : > { %v160_v10 = vadd.f32 %v159_v9, %v153_v7 }
 0x121   : > { %161 = vrot.lane.b32.xlu1 %v160_v10, %s405_s25 }
 0x193   : > { %v162_v11 = vpop.permute.xlu1 %161 }
 0x194   : > { %v163_v12 = vsel %vm524_vm0, %v162_v11, 0.0 }
 0x195   : > { %v164_v13 = vadd.f32 %v163_v12, %v132_v0 }
 0x197   : > { %165 = vst [vmem:[%s131_s27] sm:$0xff] %v164_v13 }
 0x198   : > { %351 = shalt.err (!%p348_p10)
}
 0x199   : > { %s352_s13 = scalar_lea.hbm %s178_s2, 128  ;;  %s356_s20 = scalar_lea.hbm %s568_s1, 256 }
 0x19a   : > { %p353_p2 = scmp.ne.s32.totalorder %s178_s2, %s352_s13  ;;  %p357_p7 = scmp.lt.s32.totalorder %s178_s2, %s568_s1 }
 0x19b   : > { %p358_p0 = scmp.lt.s32.totalorder %s356_s20, %s352_s13 }
 0x19c   : > { %p354_p4 = pnand %p353_p2, %p581_p12 }
 0x19d   : > { %p359_p6 = por %p358_p0, %p357_p7 }
 0x19e   : > { %p355_p9 = pneg %p354_p4 }
 0x1a0   : > { %p360_p11 = pnand %p359_p6, %p355_p9 }
 0x1a2   : > { %363 = shalt.err (!%p360_p11)
}
 0x1a3   : > { %264 = dma.vmem_to_hbm [thread:$0]  (%p581_p12), %s181_s28, 128, %s178_s2, %s167_s3  }
 0x1a4 PF: > { %s192_s23 = sand.u32 1, %s390_s6   ;;  %p582_p13 = scmp.ne.s32.totalorder %s574_s19, 0 }
 0x1a5   : > { %p583_p1 = scmp.ge.s32.totalorder %s402_s9, 2  ;;  %s193_s24 = scalar_lea.sflag [#allocation4], %s192_s23 }
 0x1a7   : > { %p271_p3 = pnand %p583_p1, %p582_p13 }
 0x1a9   : > { %p272_p5 = pneg %p271_p3 }
 0x1ab   : > { %385 = dma.done.wait (%p272_p5), %s193_s24, 128  }
 0x1ac   : > { %387 = vsyncadd (%p272_p5), %s193_s24, 4294967168  ;;  %p14_p8 = scmp.ge.s32.totalorder %s443_s12, 4   ;;  %s584_s6 = smov %s394_s7 }
 0x1ad   : > { %s585_s7 = smov %s398_s8  ;;  %s586_s8 = smov %s455_s15 }
 0x1ae   : > { %s587_s9 = smov %s443_s12  ;;  %16 = sbr.rel (!%p14_p8) target bundleno = 5 (0x5), region = 69 }
 0x1b3   :  { %198 = vsyncpa [#allocation3], 1 }
 0x1b4   :  { %200 = vsyncpa [#allocation3 + $0x1], 1 }
 0x1b5   :  { %201 = vsyncpa [#allocation4], 1 }
 0x1b6   :  { %203 = vsyncpa [#allocation4 + $0x1], 1 }

</bundles_post_ra>
